<compile_context>
chip_gen: v6e
topology: v6e:2x2x1
jax: 0.10.0
libtpu: 0.0.40
codegen_flags: <defaults>
</compile_context>

<pallas_src>
import functools

import jax
import jax.numpy as jnp
from jax.experimental import pallas as pl
from jax.experimental.pallas import tpu as pltpu


def _round_up(x, m):
    return (x + m - 1) // m * m


# -----------------------------------------------------------------------------
# MADE mask construction (host-side glue, identical semantics to the torch code)
# -----------------------------------------------------------------------------
def get_mask(in_features, out_features, in_flow_features, mask_type=None):
    if mask_type == "input":
        in_degrees = jnp.arange(in_features) % in_flow_features
    else:
        in_degrees = jnp.arange(in_features) % (in_flow_features - 1)
    if mask_type == "output":
        out_degrees = jnp.arange(out_features) % in_flow_features - 1
    else:
        out_degrees = jnp.arange(out_features) % (in_flow_features - 1)
    # (out_features, in_features), matching nn.Linear weight layout
    return (out_degrees[:, None] >= in_degrees[None, :]).astype(jnp.float32)


# -----------------------------------------------------------------------------
# Fused Pallas kernel (one batch tile per grid step)
# -----------------------------------------------------------------------------
def _made_split_kernel(x_ref, c_ref, wjx_ref, wjc_ref, bj_ref, wh_ref, bh_ref,
                       wma_ref, bma_ref, sact_ref, u_ref, ld_ref):
    x = x_ref[...]                                      # [TB, D]  f32 (kept exact)
    x_lo = x.astype(wjx_ref.dtype)                      # bf16 operand for the MXU
    c_lo = c_ref[...]                                   # [TB, Dc] bf16

    s_lane = sact_ref[...] > 0.5                        # [1, HP]: True = s/tanh lane

    # Split joiner (x-part + cond-part), both nets fused along the lane axis.
    z1 = (jnp.dot(x_lo, wjx_ref[...], preferred_element_type=jnp.float32)
          + jnp.dot(c_lo, wjc_ref[...], preferred_element_type=jnp.float32)
          + bj_ref[...])
    h1 = jnp.where(s_lane, jnp.tanh(z1), jnp.maximum(z1, 0.0))

    # Fused block-diagonal hidden layer: both nets in one 128x128 MXU op.
    z2 = jnp.dot(h1.astype(wh_ref.dtype), wh_ref[...],
                 preferred_element_type=jnp.float32) + bh_ref[...]
    h2 = jnp.where(s_lane, jnp.tanh(z2), jnp.maximum(z2, 0.0))

    # Single 256-lane output matmul: m in lanes [0, OP), a in lanes [OP, 2*OP).
    ma = jnp.dot(h2.astype(wma_ref.dtype), wma_ref[...],
                 preferred_element_type=jnp.float32) + bma_ref[...]   # [TB, 2*OP]
    op = wma_ref.shape[1] // 2
    d = x_ref.shape[1]
    m_pad = ma[:, :op]              # vreg-aligned split at lane 128
    a_pad = ma[:, op:]

    m = m_pad[:, :d]                # [TB, D]
    a = a_pad[:, :d]                # [TB, D]

    u_ref[...] = (x - m) * jnp.exp(-a)
    # a_pad is exactly zero outside [0, D) (zero-padded weights/bias), so summing
    # the full vreg matches -a.sum(-1, keepdim=True).
    ld_ref[...] = -jnp.sum(a_pad, axis=-1, keepdims=True)


# -----------------------------------------------------------------------------
# Wrapper: batch grid, constant-index weight BlockSpecs, parallel semantics
# -----------------------------------------------------------------------------
@functools.partial(jax.jit, static_argnames=("block_rows",))
def made_split_forward(x, cond, params, block_rows=1024):
    B, D = x.shape
    Dc = cond.shape[1]
    HP = params["wjx"].shape[1]     # fused (s | t) hidden width, lane aligned
    OP2 = params["wma"].shape[1]    # fused (m | a) output width (2 * padded OP)

    x = x.astype(jnp.float32)
    cond_lo = cond.astype(jnp.bfloat16)

    # >= 2 batch tiles whenever B >= 16 (pipelining + megacore sharding on v7x),
    # each tile at most ~block_rows rows (fits v7x's 64 MiB VMEM comfortably).
    B8 = _round_up(B, 8)
    num_tiles = max(2 if B8 >= 16 else 1, pl.cdiv(B8, block_rows))
    TB = _round_up(pl.cdiv(B8, num_tiles), 16)   # 16: bf16 sublane packing
    Bp = _round_up(B8, TB)
    if Bp != B:
        x = jnp.pad(x, ((0, Bp - B), (0, 0)))
        cond_lo = jnp.pad(cond_lo, ((0, Bp - B), (0, 0)))
    grid = (Bp // TB,)

    weight_args = (params["wjx"], params["wjc"], params["bj"],
                   params["wh"], params["bh"],
                   params["wma"], params["bma"], params["act_sel"])

    def const_spec(w):
        return pl.BlockSpec(tuple(w.shape), lambda i: (0, 0))

    flops = 2 * Bp * ((D + Dc) * HP + HP * HP + HP * OP2)
    transcendentals = Bp * (2 * HP + D)
    bytes_accessed = (Bp * (D * 4 + Dc * 2 + D * 4 + 4)
                      + sum(int(w.size) * w.dtype.itemsize for w in weight_args))

    u, logdet = pl.pallas_call(
        _made_split_kernel,
        out_shape=(jax.ShapeDtypeStruct((Bp, D), jnp.float32),
                   jax.ShapeDtypeStruct((Bp, 1), jnp.float32)),
        grid_spec=pltpu.PrefetchScalarGridSpec(
            num_scalar_prefetch=0,
            grid=grid,
            in_specs=[pl.BlockSpec((TB, D), lambda i: (i, 0)),
                      pl.BlockSpec((TB, Dc), lambda i: (i, 0))]
                     + [const_spec(w) for w in weight_args],
            out_specs=[pl.BlockSpec((TB, D), lambda i: (i, 0)),
                       pl.BlockSpec((TB, 1), lambda i: (i, 0))],
        ),
        compiler_params=pltpu.CompilerParams(dimension_semantics=("parallel",)),
        cost_estimate=pl.CostEstimate(flops=flops, transcendentals=transcendentals,
                                      bytes_accessed=bytes_accessed),
    )(x, cond_lo, *weight_args)

    if Bp != B:
        u = u[:B]
        logdet = logdet[:B]
    return u, logdet


# -----------------------------------------------------------------------------
# Parameter construction (nn.Linear-style init) and packing for the fused kernel
# -----------------------------------------------------------------------------
def _linear_init(key, out_features, in_features, bias=True):
    bound = 1.0 / jnp.sqrt(jnp.float32(in_features))
    kw, kb = jax.random.split(key)
    w = jax.random.uniform(kw, (out_features, in_features), jnp.float32, -bound, bound)
    b = jax.random.uniform(kb, (out_features,), jnp.float32, -bound, bound) if bias else None
    return w, b


def make_raw_params(key, num_inputs, num_hidden, num_cond_inputs):
    """Per-net pre-masked, pre-transposed ([in, out]) float32 weights."""
    D, H, Dc = num_inputs, num_hidden, num_cond_inputs
    input_mask = get_mask(D, H, D, mask_type="input")
    hidden_mask = get_mask(H, H, D)
    output_mask = get_mask(H, D, D, mask_type="output")

    keys = jax.random.split(key, 8)
    raw = {}
    for prefix, (kj, kjc, kh, ko) in (("s", keys[:4]), ("t", keys[4:])):
        wj, bj = _linear_init(kj, H, D)
        wjc, _ = _linear_init(kjc, H, Dc, bias=False)
        wh, bh = _linear_init(kh, H, H)
        wo, bo = _linear_init(ko, D, H)
        raw[prefix + "jw"] = (wj * input_mask).T          # [D, H]
        raw[prefix + "jcw"] = wjc.T                       # [Dc, H]
        raw[prefix + "jb"] = bj[None, :]                  # [1, H]
        raw[prefix + "hw"] = (wh * hidden_mask).T         # [H, H]
        raw[prefix + "hb"] = bh[None, :]
        raw[prefix + "ow"] = (wo * output_mask).T         # [H, D]
        raw[prefix + "ob"] = bo[None, :]                  # [1, D]
    return raw


def pack_params(raw, num_inputs, num_hidden, num_cond_inputs,
                matmul_dtype=jnp.bfloat16):
    D, H, Dc = num_inputs, num_hidden, num_cond_inputs
    HP = _round_up(2 * H, 128)            # fused (s | t) hidden width, lane aligned
    OP = max(128, _round_up(D, 128))      # padded per-output lane width
    assert OP >= D, "output lane padding must cover all D inputs"

    wjx = jnp.zeros((D, HP), jnp.float32)
    wjx = wjx.at[:, :H].set(raw["sjw"]).at[:, H:2 * H].set(raw["tjw"])
    wjc = jnp.zeros((Dc, HP), jnp.float32)
    wjc = wjc.at[:, :H].set(raw["sjcw"]).at[:, H:2 * H].set(raw["tjcw"])
    bj = jnp.zeros((1, HP), jnp.float32).at[:, :H].set(raw["sjb"]).at[:, H:2 * H].set(raw["tjb"])

    wh = jnp.zeros((HP, HP), jnp.float32)
    wh = wh.at[:H, :H].set(raw["shw"]).at[H:2 * H, H:2 * H].set(raw["thw"])
    bh = jnp.zeros((1, HP), jnp.float32).at[:, :H].set(raw["shb"]).at[:, H:2 * H].set(raw["thb"])

    # Fused (m | a) output weight: m -> lanes [0, OP), a -> lanes [OP, 2*OP).
    # All lanes outside [0, D) of each half are exactly zero (logdet relies on it).
    wma = jnp.zeros((HP, 2 * OP), jnp.float32)
    wma = wma.at[:H, :D].set(raw["sow"]).at[H:2 * H, OP:OP + D].set(raw["tow"])
    bma = jnp.zeros((1, 2 * OP), jnp.float32)
    bma = bma.at[:, :D].set(raw["sob"]).at[:, OP:OP + D].set(raw["tob"])

    act_sel = jnp.zeros((1, HP), jnp.float32).at[:, :H].set(1.0)   # 1 -> tanh (s), 0 -> relu (t)

    return {
        "wjx": wjx.astype(matmul_dtype), "wjc": wjc.astype(matmul_dtype), "bj": bj,
        "wh": wh.astype(matmul_dtype), "bh": bh,
        "wma": wma.astype(matmul_dtype), "bma": bma,
        "act_sel": act_sel,
    }


# -----------------------------------------------------------------------------
# Pure-JAX references
# -----------------------------------------------------------------------------
def made_split_reference_f32(x, cond, raw):
    """Original MADESplit forward ('direct') in float32 with the unfused weights."""
    h = jnp.tanh(x @ raw["sjw"] + raw["sjb"] + cond @ raw["sjcw"])
    h = jnp.tanh(h @ raw["shw"] + raw["shb"])
    m = h @ raw["sow"] + raw["sob"]

    ht = jnp.maximum(x @ raw["tjw"] + raw["tjb"] + cond @ raw["tjcw"], 0.0)
    ht = jnp.maximum(ht @ raw["thw"] + raw["thb"], 0.0)
    a = ht @ raw["tow"] + raw["tob"]

    u = (x - m) * jnp.exp(-a)
    return u, -jnp.sum(a, axis=-1, keepdims=True)


def made_split_reference_packed(x, cond, p):
    """Same packed / bf16-matmul computation as the kernel, in plain XLA."""
    D = x.shape[1]
    OP = p["wma"].shape[1] // 2
    sel = p["act_sel"] > 0.5
    z1 = (jnp.dot(x.astype(p["wjx"].dtype), p["wjx"],
                  preferred_element_type=jnp.float32)
          + jnp.dot(cond.astype(p["wjc"].dtype), p["wjc"],
                    preferred_element_type=jnp.float32)
          + p["bj"])
    h1 = jnp.where(sel, jnp.tanh(z1), jnp.maximum(z1, 0.0))
    z2 = jnp.dot(h1.astype(p["wh"].dtype), p["wh"],
                 preferred_element_type=jnp.float32) + p["bh"]
    h2 = jnp.where(sel, jnp.tanh(z2), jnp.maximum(z2, 0.0))
    ma = jnp.dot(h2.astype(p["wma"].dtype), p["wma"],
                 preferred_element_type=jnp.float32) + p["bma"]
    m = ma[:, :D]
    a = ma[:, OP:OP + D]
    u = (x - m) * jnp.exp(-a)
    return u, -jnp.sum(a, axis=-1, keepdims=True)


if __name__ == "__main__":
    num_inputs = 16
    num_hidden = 64
    num_cond_inputs = 8
    batch = 64

    key = jax.random.PRNGKey(0)
    kx, kc, kp = jax.random.split(key, 3)
    x = jax.random.normal(kx, (batch, num_inputs), jnp.float32)
    cond = jax.random.normal(kc, (batch, num_cond_inputs), jnp.float32)

    raw = make_raw_params(kp, num_inputs, num_hidden, num_cond_inputs)
    params = pack_params(raw, num_inputs, num_hidden, num_cond_inputs)

    u, logdet = made_split_forward(x, cond, params)
    jax.block_until_ready((u, logdet))

    assert u.shape == (batch, num_inputs) and logdet.shape == (batch, 1)

    # Apples-to-apples check against the same packed bf16-matmul computation in XLA.
    u_ref, ld_ref = made_split_reference_packed(x, cond, params)
    assert jnp.allclose(u, u_ref, atol=2e-3, rtol=2e-3), float(jnp.max(jnp.abs(u - u_ref)))
    assert jnp.allclose(logdet, ld_ref, atol=2e-3, rtol=2e-3), float(jnp.max(jnp.abs(logdet - ld_ref)))

    # Loose sanity check against the full-precision original-semantics reference
    # (difference comes only from the bf16 cast of the matmul operands).
    u32, ld32 = made_split_reference_f32(x, cond, raw)
    assert jnp.allclose(u, u32, atol=1e-1, rtol=1e-1)
    assert jnp.allclose(logdet, ld32, atol=1e-1, rtol=1e-1)

    print("KERNEL_OK")
</pallas_src>

<mosaic_0001>
module attributes {stable_mosaic.version = 11 : i64} {
  func.func @_made_split_kernel(%arg0: i32, %arg1: memref<32x16xf32, #tpu.memory_space<vmem>>, %arg2: memref<32x8xbf16, #tpu.memory_space<vmem>>, %arg3: memref<16x128xbf16, #tpu.memory_space<vmem>>, %arg4: memref<8x128xbf16, #tpu.memory_space<vmem>>, %arg5: memref<1x128xf32, #tpu.memory_space<vmem>>, %arg6: memref<128x128xbf16, #tpu.memory_space<vmem>>, %arg7: memref<1x128xf32, #tpu.memory_space<vmem>>, %arg8: memref<128x256xbf16, #tpu.memory_space<vmem>>, %arg9: memref<1x256xf32, #tpu.memory_space<vmem>>, %arg10: memref<1x128xf32, #tpu.memory_space<vmem>>, %arg11: memref<32x16xf32, #tpu.memory_space<vmem>>, %arg12: memref<32x1xf32, #tpu.memory_space<vmem>>) attributes {dimension_semantics = [#tpu.dimension_semantics<parallel>], iteration_bounds = array<i64: 2>, scalar_prefetch = 0 : i64, scratch_operands = 0 : i64, tpu.core_type = #tpu.core_type<tc>, window_params = [{transform_indices = @transform_0, window_bounds = array<i64: 32, 16>}, {transform_indices = @transform_1, window_bounds = array<i64: 32, 8>}, {pipeline_mode = #tpu.pipeline_mode<synchronous>, transform_indices = @transform_2, window_bounds = array<i64: 16, 128>}, {pipeline_mode = #tpu.pipeline_mode<synchronous>, transform_indices = @transform_3, window_bounds = array<i64: 8, 128>}, {pipeline_mode = #tpu.pipeline_mode<synchronous>, transform_indices = @transform_4, window_bounds = array<i64: 1, 128>}, {pipeline_mode = #tpu.pipeline_mode<synchronous>, transform_indices = @transform_5, window_bounds = array<i64: 128, 128>}, {pipeline_mode = #tpu.pipeline_mode<synchronous>, transform_indices = @transform_6, window_bounds = array<i64: 1, 128>}, {pipeline_mode = #tpu.pipeline_mode<synchronous>, transform_indices = @transform_7, window_bounds = array<i64: 128, 256>}, {pipeline_mode = #tpu.pipeline_mode<synchronous>, transform_indices = @transform_8, window_bounds = array<i64: 1, 256>}, {pipeline_mode = #tpu.pipeline_mode<synchronous>, transform_indices = @transform_9, window_bounds = array<i64: 1, 128>}, {transform_indices = @transform_10, window_bounds = array<i64: 32, 16>}, {transform_indices = @transform_11, window_bounds = array<i64: 32, 1>}]} {
    %c0 = arith.constant 0 : index
    %c0_0 = arith.constant 0 : index
    %0 = vector.load %arg1[%c0, %c0_0] : memref<32x16xf32, #tpu.memory_space<vmem>>, vector<32x16xf32>
    %1 = arith.truncf %0 : vector<32x16xf32> to vector<32x16xbf16>
    %c0_1 = arith.constant 0 : index
    %c0_2 = arith.constant 0 : index
    %2 = vector.load %arg2[%c0_1, %c0_2] : memref<32x8xbf16, #tpu.memory_space<vmem>>, vector<32x8xbf16>
    %c0_3 = arith.constant 0 : index
    %c0_4 = arith.constant 0 : index
    %3 = vector.load %arg10[%c0_3, %c0_4] : memref<1x128xf32, #tpu.memory_space<vmem>>, vector<1x128xf32>
    %cst = arith.constant 5.000000e-01 : f32
    %4 = vector.broadcast %cst : f32 to vector<1x128xf32>
    %5 = arith.cmpf ogt, %3, %4 : vector<1x128xf32>
    %c0_5 = arith.constant 0 : index
    %c0_6 = arith.constant 0 : index
    %6 = vector.load %arg3[%c0_5, %c0_6] : memref<16x128xbf16, #tpu.memory_space<vmem>>, vector<16x128xbf16>
    %cst_7 = arith.constant dense<0.000000e+00> : vector<32x128xf32>
    %7 = tpu.matmul %1, %6, %cst_7 {dimension_numbers = #tpu.dot_dimension_numbers<[1], [0], [0], [1], [0, 0, 1, 1], [], []>} : vector<32x16xbf16>, vector<16x128xbf16>, vector<32x128xf32> -> vector<32x128xf32>
    %c0_8 = arith.constant 0 : index
    %c0_9 = arith.constant 0 : index
    %8 = vector.load %arg4[%c0_8, %c0_9] : memref<8x128xbf16, #tpu.memory_space<vmem>>, vector<8x128xbf16>
    %cst_10 = arith.constant dense<0.000000e+00> : vector<32x128xf32>
    %9 = tpu.matmul %2, %8, %cst_10 {dimension_numbers = #tpu.dot_dimension_numbers<[1], [0], [0], [1], [0, 0, 1, 1], [], []>} : vector<32x8xbf16>, vector<8x128xbf16>, vector<32x128xf32> -> vector<32x128xf32>
    %10 = arith.addf %7, %9 : vector<32x128xf32>
    %c0_11 = arith.constant 0 : index
    %c0_12 = arith.constant 0 : index
    %11 = vector.load %arg5[%c0_11, %c0_12] : memref<1x128xf32, #tpu.memory_space<vmem>>, vector<1x128xf32>
    %12 = vector.broadcast %11 : vector<1x128xf32> to vector<32x128xf32>
    %13 = arith.addf %10, %12 : vector<32x128xf32>
    %14 = math.tanh %13 : vector<32x128xf32>
    %cst_13 = arith.constant 0.000000e+00 : f32
    %15 = vector.broadcast %cst_13 : f32 to vector<32x128xf32>
    %16 = arith.maximumf %13, %15 : vector<32x128xf32>
    %17 = vector.shape_cast %5 : vector<1x128xi1> to vector<1x128xi1>
    %18 = vector.broadcast %17 : vector<1x128xi1> to vector<32x128xi1>
    %19 = arith.select %18, %14, %16 : vector<32x128xi1>, vector<32x128xf32>
    %20 = arith.truncf %19 : vector<32x128xf32> to vector<32x128xbf16>
    %c0_14 = arith.constant 0 : index
    %c0_15 = arith.constant 0 : index
    %21 = vector.load %arg6[%c0_14, %c0_15] : memref<128x128xbf16, #tpu.memory_space<vmem>>, vector<128x128xbf16>
    %cst_16 = arith.constant dense<0.000000e+00> : vector<32x128xf32>
    %22 = tpu.matmul %20, %21, %cst_16 {dimension_numbers = #tpu.dot_dimension_numbers<[1], [0], [0], [1], [0, 0, 1, 1], [], []>} : vector<32x128xbf16>, vector<128x128xbf16>, vector<32x128xf32> -> vector<32x128xf32>
    %c0_17 = arith.constant 0 : index
    %c0_18 = arith.constant 0 : index
    %23 = vector.load %arg7[%c0_17, %c0_18] : memref<1x128xf32, #tpu.memory_space<vmem>>, vector<1x128xf32>
    %24 = vector.broadcast %23 : vector<1x128xf32> to vector<32x128xf32>
    %25 = arith.addf %22, %24 : vector<32x128xf32>
    %26 = math.tanh %25 : vector<32x128xf32>
    %cst_19 = arith.constant 0.000000e+00 : f32
    %27 = vector.broadcast %cst_19 : f32 to vector<32x128xf32>
    %28 = arith.maximumf %25, %27 : vector<32x128xf32>
    %29 = vector.shape_cast %5 : vector<1x128xi1> to vector<1x128xi1>
    %30 = vector.broadcast %29 : vector<1x128xi1> to vector<32x128xi1>
    %31 = arith.select %30, %26, %28 : vector<32x128xi1>, vector<32x128xf32>
    %32 = arith.truncf %31 : vector<32x128xf32> to vector<32x128xbf16>
    %c0_20 = arith.constant 0 : index
    %c0_21 = arith.constant 0 : index
    %33 = vector.load %arg8[%c0_20, %c0_21] : memref<128x256xbf16, #tpu.memory_space<vmem>>, vector<128x256xbf16>
    %cst_22 = arith.constant dense<0.000000e+00> : vector<32x256xf32>
    %34 = tpu.matmul %32, %33, %cst_22 {dimension_numbers = #tpu.dot_dimension_numbers<[1], [0], [0], [1], [0, 0, 1, 1], [], []>} : vector<32x128xbf16>, vector<128x256xbf16>, vector<32x256xf32> -> vector<32x256xf32>
    %c0_23 = arith.constant 0 : index
    %c0_24 = arith.constant 0 : index
    %35 = vector.load %arg9[%c0_23, %c0_24] : memref<1x256xf32, #tpu.memory_space<vmem>>, vector<1x256xf32>
    %36 = vector.broadcast %35 : vector<1x256xf32> to vector<32x256xf32>
    %37 = arith.addf %34, %36 : vector<32x256xf32>
    %38 = vector.extract_strided_slice %37 {offsets = [0, 0], sizes = [32, 128], strides = [1, 1]} : vector<32x256xf32> to vector<32x128xf32>
    %39 = vector.extract_strided_slice %37 {offsets = [0, 128], sizes = [32, 128], strides = [1, 1]} : vector<32x256xf32> to vector<32x128xf32>
    %40 = vector.extract_strided_slice %38 {offsets = [0, 0], sizes = [32, 16], strides = [1, 1]} : vector<32x128xf32> to vector<32x16xf32>
    %41 = vector.extract_strided_slice %39 {offsets = [0, 0], sizes = [32, 16], strides = [1, 1]} : vector<32x128xf32> to vector<32x16xf32>
    %42 = arith.subf %0, %40 : vector<32x16xf32>
    %cst_25 = arith.constant 0.000000e+00 : f32
    %43 = vector.broadcast %cst_25 : f32 to vector<32x16xf32>
    %44 = arith.subf %43, %41 : vector<32x16xf32>
    %45 = math.exp %44 : vector<32x16xf32>
    %46 = arith.mulf %42, %45 : vector<32x16xf32>
    %c0_26 = arith.constant 0 : index
    %c0_27 = arith.constant 0 : index
    %47 = vector.load %arg11[%c0_26, %c0_27] : memref<32x16xf32, #tpu.memory_space<vmem>>, vector<32x16xf32>
    tpu.vector_store %arg11[%c0_26, %c0_27], %46 {strides = array<i32>} : memref<32x16xf32, #tpu.memory_space<vmem>>, vector<32x16xf32>,
    %cst_28 = arith.constant dense<0.000000e+00> : vector<32xf32>
    %48 = vector.multi_reduction <add>, %39, %cst_28 [1] : vector<32x128xf32> to vector<32xf32>
    %49 = vector.shape_cast %48 : vector<32xf32> to vector<32x1xf32>
    %cst_29 = arith.constant 0.000000e+00 : f32
    %50 = vector.broadcast %cst_29 : f32 to vector<32x1xf32>
    %51 = arith.subf %50, %49 : vector<32x1xf32>
    %c0_30 = arith.constant 0 : index
    %c0_31 = arith.constant 0 : index
    %52 = vector.load %arg12[%c0_30, %c0_31] : memref<32x1xf32, #tpu.memory_space<vmem>>, vector<32x1xf32>
    tpu.vector_store %arg12[%c0_30, %c0_31], %51 {strides = array<i32>} : memref<32x1xf32, #tpu.memory_space<vmem>>, vector<32x1xf32>,
    return
  }
  func.func @transform_0(%arg0: i32) -> (i32, i32) {
    %c0_i32 = arith.constant 0 : i32
    %c0_i32_0 = arith.constant 0 : i32
    return %arg0, %c0_i32 : i32, i32
  }
  func.func @transform_1(%arg0: i32) -> (i32, i32) {
    %c0_i32 = arith.constant 0 : i32
    %c0_i32_0 = arith.constant 0 : i32
    return %arg0, %c0_i32 : i32, i32
  }
  func.func @transform_2(%arg0: i32) -> (i32, i32) {
    %c0_i32 = arith.constant 0 : i32
    %c0_i32_0 = arith.constant 0 : i32
    %c0_i32_1 = arith.constant 0 : i32
    return %c0_i32, %c0_i32_0 : i32, i32
  }
  func.func @transform_3(%arg0: i32) -> (i32, i32) {
    %c0_i32 = arith.constant 0 : i32
    %c0_i32_0 = arith.constant 0 : i32
    %c0_i32_1 = arith.constant 0 : i32
    return %c0_i32, %c0_i32_0 : i32, i32
  }
  func.func @transform_4(%arg0: i32) -> (i32, i32) {
    %c0_i32 = arith.constant 0 : i32
    %c0_i32_0 = arith.constant 0 : i32
    %c0_i32_1 = arith.constant 0 : i32
    return %c0_i32, %c0_i32_0 : i32, i32
  }
  func.func @transform_5(%arg0: i32) -> (i32, i32) {
    %c0_i32 = arith.constant 0 : i32
    %c0_i32_0 = arith.constant 0 : i32
    %c0_i32_1 = arith.constant 0 : i32
    return %c0_i32, %c0_i32_0 : i32, i32
  }
  func.func @transform_6(%arg0: i32) -> (i32, i32) {
    %c0_i32 = arith.constant 0 : i32
    %c0_i32_0 = arith.constant 0 : i32
    %c0_i32_1 = arith.constant 0 : i32
    return %c0_i32, %c0_i32_0 : i32, i32
  }
  func.func @transform_7(%arg0: i32) -> (i32, i32) {
    %c0_i32 = arith.constant 0 : i32
    %c0_i32_0 = arith.constant 0 : i32
    %c0_i32_1 = arith.constant 0 : i32
    return %c0_i32, %c0_i32_0 : i32, i32
  }
  func.func @transform_8(%arg0: i32) -> (i32, i32) {
    %c0_i32 = arith.constant 0 : i32
    %c0_i32_0 = arith.constant 0 : i32
    %c0_i32_1 = arith.constant 0 : i32
    return %c0_i32, %c0_i32_0 : i32, i32
  }
  func.func @transform_9(%arg0: i32) -> (i32, i32) {
    %c0_i32 = arith.constant 0 : i32
    %c0_i32_0 = arith.constant 0 : i32
    %c0_i32_1 = arith.constant 0 : i32
    return %c0_i32, %c0_i32_0 : i32, i32
  }
  func.func @transform_10(%arg0: i32) -> (i32, i32) {
    %c0_i32 = arith.constant 0 : i32
    %c0_i32_0 = arith.constant 0 : i32
    return %arg0, %c0_i32 : i32, i32
  }
  func.func @transform_11(%arg0: i32) -> (i32, i32) {
    %c0_i32 = arith.constant 0 : i32
    %c0_i32_0 = arith.constant 0 : i32
    return %arg0, %c0_i32 : i32, i32
  }
}

</mosaic_0001>

<bundles_post_ra>
// kernel: made_split_forward.1
= control target key start
LH: loop header
LB: loop body
LE: loop exit
PB: predicated region body
PF: predicated region fallthrough
CT: control target
= control target key end

     0   :  { %17 = vsyncpa [#allocation3], 0  ;;  %s1611_s0 = inlined_call_operand.vmem [shape: f32[64,16], index: 0, kind: input, shape index: {}]   ;;  %s1612_s1 = inlined_call_operand.vmem [shape: bf16[64,8], index: 1, kind: input, shape index: {}]   ;;  %s1613_s2 = inlined_call_operand.vmem [shape: bf16[16,128], index: 2, kind: input, shape index: {}]   ;;  %s1614_s3 = inlined_call_operand.vmem [shape: bf16[8,128], index: 3, kind: input, shape index: {}]   ;;  %s1615_s4 = inlined_call_operand.vmem [shape: f32[1,128], index: 4, kind: input, shape index: {}]   ;;  %s1616_s5 = inlined_call_operand.hbm [shape: bf16[128,128], index: 5, kind: input, shape index: {}]   ;;  %s1617_s6 = inlined_call_operand.vmem [shape: f32[1,128], index: 6, kind: input, shape index: {}]   ;;  %s1618_s7 = inlined_call_operand.vmem [shape: bf16[128,256], index: 7, kind: input, shape index: {}]   ;;  %s1619_s8 = inlined_call_operand.vmem [shape: f32[1,256], index: 8, kind: input, shape index: {}]   ;;  %s1620_s9 = inlined_call_operand.hbm [shape: f32[1,128], index: 9, kind: input, shape index: {}]   ;;  %s1621_s10 = inlined_call_operand.vmem [shape: f32[64,16], index: 10, kind: output, shape index: {0}]   ;;  %s1622_s11 = inlined_call_operand.vmem [shape: f32[64,1], index: 11, kind: output, shape index: {1}]  }
   0x1   :  { %18 = vsyncpa [#allocation5], 0  ;;  %s1418_s17 = smov 0  }
   0x2 LB: > { %s1093_s18 = sadd.s32 4294967295, %s1351_s17   ;;  %p1095_p0 = scmp.ge.s32.totalorder %s1351_s17, 1  ;;  %s1351_s17 = sphi %s1418_s17, %s24_s17  }
   0x3   : > { %p301_p1 = scmp.lt.s32.totalorder %s1351_s17, 3  ;;  %s1353_s19 = smov [#allocation2]  }
   0x4   : > { %s322_s20 = sshll.u32 %s1353_s19, 4  ;;  %p1432_p3 = scmp.eq.s32.totalorder %s1093_s18, 0  ;;  %s323_s20 = int_to_ptr.vmem [resolvable:$true] %s322_s20 }
   0x5   : > { %p1426_p2 = pnand %p1095_p0, %p301_p1  ;;  %s1354_s23 = smov [#allocation4]  }
   0x6   : > { %s345_s24 = sshll.u32 %s1354_s23, 4  ;;  %s1296_s26 = scalar_lea.vmem %s323_s20, 1024  ;;  %s346_s24 = int_to_ptr.vmem [resolvable:$true] %s345_s24 }
   0x7   : > { %p1202_p4 = pneg %p1426_p2  ;;  %p1297_p7 = scmp.ne.s32.totalorder %s323_s20, %s1296_s26 }
   0x8   : > { %p1304_p10 = scmp.lt.s32.totalorder %s323_s20, %s323_s20  ;;  %p1305_p11 = scmp.lt.s32.totalorder %s1296_s26, %s1296_s26 }
   0x9   : > { %p1440_p5 = pnand %p1432_p3, %p1202_p4 }
   0xa   : > { %p1306_p12 = por %p1305_p11, %p1304_p10 }
   0xb   : > { %p1287_p6 = pneg %p1440_p5 }
   0xd   : > { %p1299_p8 = pnand %p1297_p7, %p1287_p6 }
   0xf   : > { %p1300_p9 = pneg %p1299_p8 }
  0x11   : > { %p1307_p13 = pnand %p1306_p12, %p1300_p9 }
  0x13   : > { %1310 = shalt.err (!%p1307_p13)
}
  0x14   : > { %s1355_s27 = smov 64   ;;  %s1356_s28 = smov 4  }
  0x15   : > { %1205 = dma.hbm_to_vmem [thread:$0]  (!%p1440_p5), %s1616_s5, 1024, %s323_s20, [#allocation3], %s1355_s27, %s1355_s27, %s1356_s28  }
  0x16   : > { %s1322_s12 = scalar_lea.vmem %s346_s24, 16  ;;  %s1329_s13 = scalar_lea.vmem %s346_s24, 32 }
  0x17   : > { %p1323_p0 = scmp.ne.s32.totalorder %s346_s24, %s1322_s12  ;;  %p1330_p7 = scmp.lt.s32.totalorder %s346_s24, %s346_s24 }
  0x18   : > { %p1331_p8 = scmp.lt.s32.totalorder %s1329_s13, %s1322_s12 }
  0x19   : > { %p1325_p1 = pnand %p1323_p0, %p1287_p6 }
  0x1a   : > { %p1332_p9 = por %p1331_p8, %p1330_p7 }
  0x1b   : > { %p1326_p4 = pneg %p1325_p1 }
  0x1d   : > { %p1333_p10 = pnand %p1332_p9, %p1326_p4 }
  0x1f   : > { %1336 = shalt.err (!%p1333_p10)
}
  0x20   : > { %1208 = dma.hbm_to_vmem [thread:$0]  (!%p1440_p5), %s1620_s9, 16, %s346_s24, [#allocation5]  }
  0x21   : > { %376 = sbr.rel (%p1426_p2) target bundleno = 841 (0x349), region = 60 }
  0x26   : > { %1342 = dma.done.wait (%p1432_p3), [#allocation3], 1024  }
  0x27   : > { %1344 = vsyncadd (%p1432_p3), [#allocation3], 4294966272 }
  0x28   : > { %1346 = dma.done.wait (%p1432_p3), [#allocation5], 16  }
  0x29   : > { %1348 = vsyncadd (%p1432_p3), [#allocation5], 4294967280  ;;  %s1102_s16 = sshll.u32 %s1093_s18, 2  ;;  %vm487_vm0 = vcmask 1043456   ;;  %vm480_vm1 = vcmask 64512   ;;  %v1226_v2 = vld [vmem:[%s1613_s2] sm:$0xff]   ;;  %v622_v40 = vlaneseq }
  0x2a   : > { %p431_p6 = scmp.lt.s32.totalorder %s1102_s16, 7  ;;  %v469_v0 = vld [vmem:[%s1614_s3] sm:$0xf]  ;;  %1167 = vmatprep.subr.bf16.mxu1 %v1226_v2  ;;  %vm546_vm2 = vcmask 130048   ;;  %v1229_v11 = vld [vmem:[#allocation2 + $0x38] sm:$0xff]   ;;  %v1230_v12 = vld [vmem:[#allocation2 + $0x30] sm:$0xff]  }
  0x2b   : > { %1193 = vmatprep.subr.msk.bf16.mxu0 %vm487_vm0, %v469_v0  ;;  %v489_v1 = vsel %vm487_vm0, %v469_v0, 0  ;;  %1168 = vmatpush3.bf16.msra.mxu1 %v1226_v2  ;;  %v1231_v13 = vld [vmem:[#allocation2 + $0x28] sm:$0xff]   ;;  %v1232_v14 = vld [vmem:[#allocation2 + $0x20] sm:$0xff]   ;;  %v1233_v15 = vld [vmem:[#allocation2 + $0x18] sm:$0xff]   ;;  %v1357_v17 = vmov 0   ;;  %v1521_v43 = vshrl.u32 %v622_v40, 7 }
  0x2c   : > { %s1627_s16 = smov (!%p431_p6, %s1102_s16), 7  ;;  %1162 = vmatpush3.bf16.msra.mxu0 %v489_v1  ;;  %v1234_v16 = vld [vmem:[#allocation2 + $0x10] sm:$0xff]   ;;  %v1235_v18 = vld [vmem:[#allocation2 + $0x8] sm:$0xff]   ;;  %v1236_v19 = vld [vmem:[#allocation2] sm:$0xff]   ;;  %vm964_vm5 = vcmask 7168  }
  0x2d   : > { %s1105_s19 = sshll.u32 %s1627_s16, 2  ;;  %s1474_s20 = sshll.u32 %s1627_s16, 3  ;;  %1173 = vmatprep.subr.bf16.mxu0 %v1229_v11  ;;  %v1237_v20 = vld [vmem:[%s1618_s7 + $0x70] ss:$8 sps:$4 sm:$0xff]   ;;  %v1239_v21 = vld [vmem:[%s1618_s7 + $0x74] ss:$8 sps:$4 sm:$0xff]  }
  0x2e   : > { %s440_s24 = scalar_lea.vmem %s1612_s1, %s1105_s19  ;;  %s434_s18 = scalar_lea.vmem %s1611_s0, %s1474_s20  ;;  %v1242_v22 = vld [vmem:[%s1618_s7 + $0x64] ss:$8 sps:$4 sm:$0xff]   ;;  %875 = vmatprep.subr.bf16.mxu1 %v1239_v21  ;;  %v1240_v23 = vld [vmem:[%s1618_s7 + $0x60] ss:$8 sps:$4 sm:$0xff]   ;;  %v624_v44 = vsub.s32 0, %v1521_v43 }
  0x2f   : > { %v1227_v3 = vld [vmem:[%s440_s24] sm:$0xff]   ;;  %v1228_v4 = vld [vmem:[%s440_s24 + $0x8] sm:$0xff]   ;;  %v1496_v8 = vld [vmem:[%s434_s18 + $0x10] sm:$0xff]  ;;  %s446_s19 = scalar_lea.vmem %s1621_s10, %s1474_s20  ;;  %s452_s24 = scalar_lea.vmem %s1622_s11, %s1474_s20 }
  0x30   : > { %v1489_v5 = vld [vmem:[%s434_s18] sm:$0xff]  ;;  %v1491_v6 = vld [vmem:[%s434_s18 + $0x8] sm:$0xff]  ;;  %1163 = vmatprep.mubr.msk.bf16.mxu0 %vm480_vm1, %v1227_v3  ;;  %v1498_v9 = vld [vmem:[%s434_s18 + $0x18] sm:$0xff] }
  0x31   : > { %v459_v7 = vpack.c.bf16 %v1491_v6, %v1489_v5  ;;  %1164 = vmatmul.mubr.msk.bf16.vlgmr.msra.gmra.mxu0 %vm480_vm1, %v1228_v4  ;;  %v460_v10 = vpack.c.bf16 %v1498_v9, %v1496_v8  ;;  %v1117_v30 = vld [vmem:[%s1615_s4] ss:$0 sm:$0xff]  ;;  %v1245_v61 = vld [vmem:[%s1618_s7 + $0x54] ss:$8 sps:$4 sm:$0xff]   ;;  %v1243_v62 = vld [vmem:[%s1618_s7 + $0x50] ss:$8 sps:$4 sm:$0xff]  }
  0x32   : > { %1174 = vmatpush3.bf16.msra.mxu0 %v1229_v11  ;;  %v465_v42 = vld [vmem:[#allocation4] sm:$0x1]  ;;  %v1248_v63 = vld [vmem:[%s1618_s7 + $0x44] ss:$8 sps:$4 sm:$0xff]   ;;  %v1251_v1 = vld [vmem:[%s1618_s7 + $0x34] ss:$8 sps:$4 sm:$0xff]  }
  0x33   : > { %1169 = vmatprep.mubr.msk.bf16.mxu1 %vm546_vm2, %v459_v7  ;;  %1175 = vmatprep.subr.bf16.mxu0 %v1230_v12  ;;  %vm466_vm3 = vcmp.gt.f32.partialorder %v465_v42, 0.5  ;;  %v1246_v0 = vld [vmem:[%s1618_s7 + $0x40] ss:$8 sps:$4 sm:$0xff]   ;;  %v1249_v2 = vld [vmem:[%s1618_s7 + $0x30] ss:$8 sps:$4 sm:$0xff]  }
  0x34   : > { %1170 = vmatmul.mubr.msk.bf16.vlgmr.msra.gmra.mxu1 %vm546_vm2, %v460_v10  ;;  %v621_v45 = vsel %vm466_vm3, 1, %v1357_v17  ;;  %v1254_v3 = vld [vmem:[%s1618_s7 + $0x24] ss:$8 sps:$4 sm:$0xff]   ;;  %v1252_v4 = vld [vmem:[%s1618_s7 + $0x20] ss:$8 sps:$4 sm:$0xff]  }
  0x35   : > { %907 = vmatprep.mubr.bf16.mxu1 %v1357_v17  ;;  %876 = vmatpush1.bf16.msra.mxu1 %v1237_v20  ;;  %v1527_v46 = vrot.slane %v621_v45, %v624_v44  ;;  %v1257_v7 = vld [vmem:[%s1618_s7 + $0x14] ss:$8 sps:$4 sm:$0xff]   ;;  %v1255_v10 = vld [vmem:[%s1618_s7 + $0x10] ss:$8 sps:$4 sm:$0xff]   ;;  %v1260_v11 = vld [vmem:[%s1618_s7 + $0x4] ss:$8 sps:$4 sm:$0xff]  }
  0x36   : > { %1176 = vmatpush3.bf16.msra.mxu0 %v1230_v12  ;;  %877 = vmatprep.subr.bf16.mxu1 %v1242_v22  ;;  %v1258_v12 = vld [vmem:[%s1618_s7] ss:$8 sps:$4 sm:$0xff]  }
  0x37   : > { %1177 = vmatprep.subr.bf16.mxu0 %v1231_v13  ;;  %vm626_vm4 = vcmp.eq.s32.totalorder %v1527_v46, 1 }
  0x39   : > { %878 = vmatpush1.bf16.msra.mxu1 %v1240_v23 }
  0x3a   : > { %1178 = vmatpush3.bf16.msra.mxu0 %v1231_v13  ;;  %879 = vmatprep.subr.bf16.mxu1 %v1245_v61 }
  0x3b   : > { %1179 = vmatprep.subr.bf16.mxu0 %v1232_v14 }
  0x3d   : > { %880 = vmatpush1.bf16.msra.mxu1 %v1243_v62 }
  0x3e   : > { %1180 = vmatpush3.bf16.msra.mxu0 %v1232_v14  ;;  %881 = vmatprep.subr.bf16.mxu1 %v1248_v63  ;;  %v1118_v14 = vld [vmem:[%s1617_s6] ss:$0 sm:$0xff] }
  0x3f   : > { %1181 = vmatprep.subr.bf16.mxu0 %v1233_v15 }
  0x41   : > { %882 = vmatpush1.bf16.msra.mxu1 %v1246_v0 }
  0x42   : > { %1182 = vmatpush3.bf16.msra.mxu0 %v1233_v15  ;;  %883 = vmatprep.subr.bf16.mxu1 %v1251_v1 }
  0x43   : > { %1183 = vmatprep.subr.bf16.mxu0 %v1234_v16 }
  0x45   : > { %884 = vmatpush1.bf16.msra.mxu1 %v1249_v2 }
  0x46   : > { %1184 = vmatpush3.bf16.msra.mxu0 %v1234_v16  ;;  %885 = vmatprep.subr.bf16.mxu1 %v1254_v3 }
  0x47   : > { %1185 = vmatprep.subr.bf16.mxu0 %v1235_v18 }
  0x49   : > { %886 = vmatpush1.bf16.msra.mxu1 %v1252_v4 }
  0x4a   : > { %1186 = vmatpush3.bf16.msra.mxu0 %v1235_v18  ;;  %887 = vmatprep.subr.bf16.mxu1 %v1257_v7 }
  0x4b   : > { %1187 = vmatprep.subr.bf16.mxu0 %v1236_v19 }
  0x4d   : > { %888 = vmatpush1.bf16.msra.mxu1 %v1255_v10 }
  0x4e   : > { %1188 = vmatpush3.bf16.msra.mxu0 %v1236_v19  ;;  %889 = vmatprep.subr.bf16.mxu1 %v1260_v11 }
  0x51   : > { %890 = vmatpush1.bf16.msra.mxu1 %v1258_v12 }
  0xf1   : > { %v1165_v24 = vpop.f32.mrf.mxu0 }
  0xf3   : > { %v525_v25 = vpop.f32.mrf.mxu0 }
  0xf4   : > { %v1171_v26 = vpop.f32.mrf.mxu1 }
  0xf5   : > { %v596_v27 = vadd.f32 %v1171_v26, %v1165_v24  ;;  %v1166_v28 = vpop.f32.mrf.mxu0 }
  0xf6   : > { %v587_v29 = vpop.f32.mrf.mxu1 }
  0xf7   : > { %v588_v31 = vadd.f32 %v587_v29, %v525_v25  ;;  %v528_v32 = vpop.f32.mrf.mxu0  ;;  %v611_v36 = vadd.f32 %v1117_v30, %v596_v27 }
  0xf8   : > { %v1172_v33 = vpop.f32.mrf.mxu1 }
  0xf9   : > { %v609_v34 = vadd.f32 %v1117_v30, %v588_v31  ;;  %v599_v35 = vadd.f32 %v1172_v33, %v1166_v28  ;;  %v619_v54 = vmax.f32 %v611_v36, 0.0 }
  0xfa   : > { %v590_v37 = vpop.f32.mrf.mxu1 }
  0xfb   : > { %v612_v38 = vadd.f32 %v1117_v30, %v599_v35  ;;  %v591_v39 = vadd.f32 %v590_v37, %v528_v32  ;;  %1261 = vtanh.f32 %v609_v34  ;;  %v617_v51 = vmax.f32 %v609_v34, 0.0 }
  0xfc   : > { %v791_v37 = vsub.s32 1, %v1521_v43 }
  0xfd   : > { %1263 = vtanh.f32 %v612_v38  ;;  %v610_v41 = vadd.f32 %v1117_v30, %v591_v39  ;;  %v620_v49 = vmax.f32 %v612_v38, 0.0  ;;  %v783_v38 = vld [vmem:[%s1619_s8] sm:$0x3] }
  0xfe   : > { %1265 = vtanh.f32 %v611_v36  ;;  %v792_v39 = vrot.slane %v783_v38, %v791_v37 }
  0xff   : > { %1267 = vtanh.f32 %v610_v41  ;;  %v618_v52 = vmax.f32 %v610_v41, 0.0 }
 0x108   : > { %v1262_v47 = vpop.eup %1261 }
 0x109   : > { %v627_v56 = vsel %vm626_vm4, %v1262_v47, %v617_v51 }
 0x10a   : > { %v1264_v48 = vpop.eup %1263 }
 0x10b   : > { %v1266_v50 = vpop.eup %1265  ;;  %v630_v55 = vsel %vm626_vm4, %v1264_v48, %v620_v49 }
 0x10c   : > { %v1268_v53 = vpop.eup %1267  ;;  %v629_v59 = vsel %vm626_vm4, %v1266_v50, %v619_v54 }
 0x10d   : > { %v628_v57 = vsel %vm626_vm4, %v1268_v53, %v618_v52  ;;  %v632_v60 = vpack.c.bf16 %v630_v55, %v629_v59  ;;  %v788_v55 = vrot.slane %v783_v38, %v624_v44 }
 0x10e   : > { %v631_v58 = vpack.c.bf16 %v628_v57, %v627_v56 }
 0x110   : > { %1189 = vmatprep.mubr.bf16.mxu0 %v631_v58 }
 0x111   : > { %1190 = vmatmul.mubr.bf16.vlgmr.msra.gmra.mxu0 %v632_v60 }
 0x1d1   : > { %v1191_v13 = vpop.f32.mrf.mxu0 }
 0x1d2   : > { %v747_v22 = vadd.f32 %v1191_v13, %v1118_v14 }
 0x1d3   : > { %v738_v15 = vpop.f32.mrf.mxu0 }
 0x1d4   : > { %v739_v16 = vadd.f32 %v1118_v14, %v738_v15  ;;  %v759_v33 = vmax.f32 %v747_v22, 0.0 }
 0x1d5   : > { %v1192_v18 = vpop.f32.mrf.mxu0 }
 0x1d6   : > { %1269 = vtanh.f32 %v739_v16  ;;  %v750_v21 = vadd.f32 %v1192_v18, %v1118_v14  ;;  %v757_v24 = vmax.f32 %v739_v16, 0.0 }
 0x1d7   : > { %v741_v19 = vpop.f32.mrf.mxu0 }
 0x1d8   : > { %v742_v20 = vadd.f32 %v1118_v14, %v741_v19  ;;  %v760_v31 = vmax.f32 %v750_v21, 0.0 }
 0x1da   : > { %1271 = vtanh.f32 %v742_v20  ;;  %v758_v25 = vmax.f32 %v742_v20, 0.0 }
 0x1db   : > { %1273 = vtanh.f32 %v750_v21 }
 0x1dc   : > { %1275 = vtanh.f32 %v747_v22 }
 0x1e3   : > { %v1270_v23 = vpop.eup %1269 }
 0x1e4   : > { %v761_v27 = vsel %vm626_vm4, %v1270_v23, %v757_v24 }
 0x1e7   : > { %v1272_v26 = vpop.eup %1271 }
 0x1e8   : > { %v762_v28 = vsel %vm626_vm4, %v1272_v26, %v758_v25  ;;  %v1274_v30 = vpop.eup %1273 }
 0x1e9   : > { %v765_v29 = vpack.c.bf16 %v762_v28, %v761_v27  ;;  %v1276_v32 = vpop.eup %1275  ;;  %v764_v34 = vsel %vm626_vm4, %v1274_v30, %v760_v31 }
 0x1ea   : > { %v763_v35 = vsel %vm626_vm4, %v1276_v32, %v759_v33 }
 0x1eb   : > { %908 = vmatmul.mubr.bf16.vlgmr.msra.gmra.mxu1 %v765_v29  ;;  %v766_v36 = vpack.c.bf16 %v764_v34, %v763_v35 }
 0x1ec   : > { %917 = vmatprep.mubr.bf16.mxu1 %v1357_v17 }
 0x1f3   : > { %918 = vmatmul.mubr.bf16.gmra.mxu1 %v766_v36 }
 0x2ab   : > { %v909_v40 = vpop.f32.mrf.mxu1 }
 0x2ac   : > { %v910_v60 = vadd.f32 %v909_v40, %v788_v55 }
 0x2ad   : > { %v911_v41 = vpop.f32.mrf.mxu1 }
 0x2ae   : > { %v912_v17 = vadd.f32 %v911_v41, %v792_v39  ;;  %v928_v63 = vsub.f32 %v1489_v5, %v910_v60 }
 0x2af   : > { %v913_v42 = vpop.f32.mrf.mxu1 }
 0x2b0   : > { %v932_v45 = vsub.f32 0.0, %v912_v17  ;;  %952 = vadd.xlane.f32.xlu0 %v912_v17  ;;  %v914_v0 = vadd.f32 %v913_v42, %v788_v55 }
 0x2b1   : > { %v915_v47 = vpop.f32.mrf.mxu1 }
 0x2b2   : > { %v936_v48 = vmul.f32 1.442695, %v932_v45  ;;  %v916_v49 = vadd.f32 %v915_v47, %v792_v39  ;;  %v929_v44 = vsub.f32 %v1491_v6, %v914_v0 }
 0x2b3   : > { %v919_v46 = vpop.f32.mrf.mxu1 }
 0x2b4   : > { %1277 = vpow2.f32 %v936_v48  ;;  %v933_v50 = vsub.f32 0.0, %v916_v49  ;;  %954 = vadd.xlane.f32.xlu0 %v916_v49  ;;  %v920_v2 = vadd.f32 %v919_v46, %v788_v55 }
 0x2b5   : > { %v921_v51 = vpop.f32.mrf.mxu1 }
 0x2b6   : > { %v938_v52 = vmul.f32 1.442695, %v933_v50  ;;  %v922_v53 = vadd.f32 %v921_v51, %v792_v39  ;;  %v930_v5 = vsub.f32 %v1496_v8, %v920_v2 }
 0x2b7   : > { %v923_v54 = vpop.f32.mrf.mxu1 }
 0x2b8   : > { %1279 = vpow2.f32 %v938_v52  ;;  %v934_v56 = vsub.f32 0.0, %v922_v53  ;;  %956 = vadd.xlane.f32.xlu1 %v922_v53  ;;  %v924_v7 = vadd.f32 %v923_v54, %v788_v55 }
 0x2b9   : > { %v925_v57 = vpop.f32.mrf.mxu1 }
 0x2ba   : > { %v940_v58 = vmul.f32 1.442695, %v934_v56  ;;  %v926_v59 = vadd.f32 %v925_v57, %v792_v39  ;;  %v931_v12 = vsub.f32 %v1498_v9, %v924_v7 }
 0x2bc   : > { %1281 = vpow2.f32 %v940_v58  ;;  %v935_v61 = vsub.f32 0.0, %v926_v59  ;;  %958 = vadd.xlane.f32.xlu1 %v926_v59 }
 0x2be   : > { %v942_v62 = vmul.f32 1.442695, %v935_v61 }
 0x2c0   : > { %1283 = vpow2.f32 %v942_v62 }
 0x2c1   : > { %v1278_v1 = vpop.eup %1277 }
 0x2c2   : > { %v944_v43 = vmul.f32 %v1278_v1, %v928_v63 }
 0x2c4   : > { %948 = vst.msk [vmem:[%s446_s19] sm:$0xff] %vm546_vm2, %v944_v43 }
 0x2c5   : > { %v1280_v3 = vpop.eup %1279 }
 0x2c6   : > { %v945_v4 = vmul.f32 %v1280_v3, %v929_v44 }
 0x2c8   : > { %949 = vst.msk [vmem:[%s446_s19 + $0x8] sm:$0xff] %vm546_vm2, %v945_v4 }
 0x2c9   : > { %v1282_v10 = vpop.eup %1281 }
 0x2ca   : > { %v946_v11 = vmul.f32 %v1282_v10, %v930_v5 }
 0x2cc   : > { %950 = vst.msk [vmem:[%s446_s19 + $0x10] sm:$0xff] %vm546_vm2, %v946_v11 }
 0x2cd   : > { %v1284_v13 = vpop.eup %1283 }
 0x2ce   : > { %v947_v14 = vmul.f32 %v1284_v13, %v931_v12 }
 0x2d0   : > { %951 = vst.msk [vmem:[%s446_s19 + $0x18] sm:$0xff] %vm546_vm2, %v947_v14 }
 0x339   : > { %v953_v6 = vpop.xlane.xlu0 %952 }
 0x33a   : > { %v960_v15 = vsub.f32 0.0, %v953_v6 }
 0x33c   : > { %965 = vst.msk [vmem:[%s452_s24] sm:$0xff] %vm964_vm5, %v960_v15 }
 0x33d   : > { %v955_v8 = vpop.xlane.xlu0 %954 }
 0x33e   : > { %v961_v16 = vsub.f32 0.0, %v955_v8 }
 0x340   : > { %966 = vst.msk [vmem:[%s452_s24 + $0x8] sm:$0xff] %vm964_vm5, %v961_v16 }
 0x341   : > { %v957_v18 = vpop.xlane.xlu1 %956 }
 0x342   : > { %v962_v19 = vsub.f32 0.0, %v957_v18 }
 0x344   : > { %967 = vst.msk [vmem:[%s452_s24 + $0x10] sm:$0xff] %vm964_vm5, %v962_v19 }
 0x345   : > { %v959_v20 = vpop.xlane.xlu1 %958 }
 0x346   : > { %v963_v9 = vsub.f32 0.0, %v959_v20 }
 0x348   : > { %968 = vst.msk [vmem:[%s452_s24 + $0x18] sm:$0xff] %vm964_vm5, %v963_v9 }
 0x349 PF: > { %s24_s17 = sadd.s32 1, %s1351_s17  }
 0x34a   : > { %p21_p2 = scmp.ge.s32.totalorder %s24_s17, 4  }
 0x34c   :  { %23 = sbr.rel (!%p21_p2) target bundleno = 2 (0x2), region = 114 }
 0x351   :  { %1008 = vsyncpa [#allocation3], 1 }
 0x352   :  { %1010 = vsyncpa [#allocation3 + $0x1], 1 }
 0x353   :  { %1011 = vsyncpa [#allocation5], 1 }

</bundles_post_ra>
